<compile_context>
chip_gen: v7x
topology: tpu7x:2x2x1
jax: 0.10.0
libtpu: 0.0.40
codegen_flags: <defaults>
</compile_context>

<pallas_src>
import functools
import math

import numpy as np
import jax
import jax.numpy as jnp
from jax.experimental import pallas as pl
from jax.experimental.pallas import tpu as pltpu


# ----------------------------------------------------------------------------
# helpers
# ----------------------------------------------------------------------------
def _round_up(x, m):
    return ((x + m - 1) // m) * m


def _pick_tile(dim, candidates):
    """Largest candidate that exactly divides dim; fall back to the full dim."""
    for c in candidates:
        if c <= dim and dim % c == 0:
            return c
    return dim


def _vmem_limit_bytes():
    """Generation-aware VMEM budget (v5e/v6e: 128 MiB, v7x: 64 MiB per core)."""
    cap = 64 * 1024 * 1024
    try:
        cap = int(getattr(pltpu.get_tpu_info(), "vmem_capacity_bytes", cap))
    except Exception:
        pass
    return int(min(cap * 3 // 4, 100 * 1024 * 1024))


# ----------------------------------------------------------------------------
# tiled linear: y = x @ w + b   (bf16 operands, f32 accumulation)
# ----------------------------------------------------------------------------
def _linear_kernel(x_ref, w_ref, b_ref, o_ref, acc_ref):
    @pl.when(pl.program_id(2) == 0)
    def _():
        acc_ref[...] = jnp.zeros_like(acc_ref)

    acc_ref[...] += jnp.dot(x_ref[...], w_ref[...],
                            preferred_element_type=jnp.float32)

    @pl.when(pl.program_id(2) == pl.num_programs(2) - 1)
    def _():
        o_ref[...] = (acc_ref[...] + b_ref[...].astype(jnp.float32)).astype(o_ref.dtype)


def pallas_linear(x, w, b, out_dtype=None):
    """x: [T, Cin] (bf16), w: [Cin, Cout] (bf16), b: [1, Cout] (f32) -> [T, Cout]."""
    T, Cin = x.shape
    Cout = w.shape[1]
    out_dtype = out_dtype or x.dtype

    # Row tile: pad T up to the tile instead of shrinking the tile.
    tm = min(512, _round_up(T, 8))
    Tp = _round_up(T, tm)
    if Tp != T:
        x = jnp.pad(x, ((0, Tp - T), (0, 0)))

    # Lane-dim tiles must be multiples of 128 (or the full dim).
    tn = _pick_tile(Cout, (768, 512, 384, 256, 128))
    tk = _pick_tile(Cin, (768, 512, 384, 256, 128))
    grid = (Tp // tm, Cout // tn, Cin // tk)

    cost = pl.CostEstimate(
        flops=int(2 * Tp * Cin * Cout),
        transcendentals=0,
        bytes_accessed=int(x.size * x.dtype.itemsize + w.size * w.dtype.itemsize
                           + b.size * b.dtype.itemsize
                           + Tp * Cout * jnp.dtype(out_dtype).itemsize),
    )

    out = pl.pallas_call(
        _linear_kernel,
        out_shape=jax.ShapeDtypeStruct((Tp, Cout), out_dtype),
        grid=grid,
        in_specs=[
            pl.BlockSpec((tm, tk), lambda i, j, k: (i, k)),
            pl.BlockSpec((tk, tn), lambda i, j, k: (k, j)),
            pl.BlockSpec((1, tn), lambda i, j, k: (0, j)),
        ],
        out_specs=pl.BlockSpec((tm, tn), lambda i, j, k: (i, j)),
        scratch_shapes=[pltpu.VMEM((tm, tn), jnp.float32)],
        compiler_params=pltpu.CompilerParams(
            dimension_semantics=("parallel", "parallel", "arbitrary"),
            vmem_limit_bytes=_vmem_limit_bytes(),
        ),
        cost_estimate=cost,
    )(x, w, b)
    return out[:T] if Tp != T else out


# ----------------------------------------------------------------------------
# flash-style cross attention
#   q: [B, H, Nq, Dh] (bf16), k/v: [B, H, Mpad, Dh] (bf16), klen: int32 [B]
#   -> [B, H, Nq, Dh] (bf16)
# ----------------------------------------------------------------------------
def _cross_attn_kernel(klen_ref, q_ref, k_ref, v_ref, o_ref,
                       m_sc, l_sc, acc_sc, *, head_dim, kv_tile):
    b = pl.program_id(0)
    kv = pl.program_id(2)
    klen = klen_ref[b]

    @pl.when(kv == 0)
    def _init():
        m_sc[...] = jnp.full_like(m_sc, -jnp.inf)
        l_sc[...] = jnp.zeros_like(l_sc)
        acc_sc[...] = jnp.zeros_like(acc_sc)

    chunk_start = kv * kv_tile

    @pl.when(chunk_start < klen)          # skip compute on fully-padded KV chunks
    def _compute():
        scale = 1.0 / math.sqrt(head_dim)
        q = q_ref[0] * scale              # [H, tq, Dh] bf16, scale folded into q
        k = k_ref[0]                      # [H, kv_tile, Dh]
        v = v_ref[0]

        s = jnp.einsum('hqd,hkd->hqk', q, k,
                       preferred_element_type=jnp.float32)       # [H, tq, kv_tile] f32

        col = chunk_start + jax.lax.broadcasted_iota(jnp.int32, (1, 1, kv_tile), 2)
        s = jnp.where(col >= klen, jnp.float32(-1e8), s)          # matches torch_impl

        m_prev = m_sc[...]
        m_new = jnp.maximum(m_prev, jnp.max(s, axis=-1, keepdims=True))
        alpha = jnp.exp(m_prev - m_new)
        p = jnp.exp(s - m_new)
        l_sc[...] = alpha * l_sc[...] + jnp.sum(p, axis=-1, keepdims=True)
        acc_sc[...] = alpha * acc_sc[...] + jnp.einsum(
            'hqk,hkd->hqd', p.astype(v.dtype), v,
            preferred_element_type=jnp.float32)
        m_sc[...] = m_new

    @pl.when(kv == pl.num_programs(2) - 1)
    def _finalize():
        inv_l = pl.reciprocal(l_sc[...], approx=True)
        o_ref[0] = (acc_sc[...] * inv_l).astype(o_ref.dtype)


def pallas_cross_attention(q, k, v, klen):
    """q: [B, H, N, Dh], k/v: [B, H, Mpad, Dh], klen: int32 [B] -> [B, H, N, Dh]."""
    B, H, N, Dh = q.shape
    Mpad = k.shape[2]
    kv_tile = _pick_tile(Mpad, (512, 256, 128))      # Mpad is a multiple of 128
    tq = min(256, _round_up(N, 8))
    Np = _round_up(N, tq)
    if Np != N:
        q = jnp.pad(q, ((0, 0), (0, 0), (0, Np - N), (0, 0)))
    grid = (B, Np // tq, Mpad // kv_tile)

    kernel = functools.partial(_cross_attn_kernel, head_dim=Dh, kv_tile=kv_tile)

    def q_map(b, qi, kv, klen_ref):
        return (b, 0, qi, 0)

    def kv_map(b, qi, kv, klen_ref):
        # Clamp to the last chunk holding valid keys: fully-padded chunks revisit the
        # same block index, so their HBM->VMEM DMA is skipped by the pipeline.
        last = jnp.maximum((klen_ref[b] + kv_tile - 1) // kv_tile - 1, 0)
        return (b, 0, jnp.minimum(kv, last), 0)

    itemsize = q.dtype.itemsize
    cost = pl.CostEstimate(
        flops=int(4 * B * H * Np * Mpad * Dh),
        transcendentals=int(B * H * Np * Mpad),
        bytes_accessed=int((2 * q.size + k.size + v.size) * itemsize),
    )

    out = pl.pallas_call(
        kernel,
        out_shape=jax.ShapeDtypeStruct((B, H, Np, Dh), q.dtype),
        grid_spec=pltpu.PrefetchScalarGridSpec(
            num_scalar_prefetch=1,
            grid=grid,
            in_specs=[
                pl.BlockSpec((1, H, tq, Dh), q_map),
                pl.BlockSpec((1, H, kv_tile, Dh), kv_map),
                pl.BlockSpec((1, H, kv_tile, Dh), kv_map),
            ],
            out_specs=pl.BlockSpec((1, H, tq, Dh), q_map),
            scratch_shapes=[
                pltpu.VMEM((H, tq, 1), jnp.float32),    # running max
                pltpu.VMEM((H, tq, 1), jnp.float32),    # running denominator
                pltpu.VMEM((H, tq, Dh), jnp.float32),   # running PV accumulator
            ],
        ),
        compiler_params=pltpu.CompilerParams(
            dimension_semantics=("parallel", "parallel", "arbitrary"),
            vmem_limit_bytes=_vmem_limit_bytes(),
        ),
        cost_estimate=cost,
    )(klen, q, k, v)
    return out[:, :, :N] if Np != N else out


# ----------------------------------------------------------------------------
# Module
# ----------------------------------------------------------------------------
class MultiHeadCrossAttentionPallas:
    def __init__(self, d_model, num_heads, key):
        assert d_model % num_heads == 0
        self.d_model = d_model
        self.num_heads = num_heads
        self.head_dim = d_model // num_heads
        k1, k2, k3, k4, k5, k6 = jax.random.split(key, 6)
        s = 0.02
        # weights stored as [Cin, Cout] (transposed nn.Linear weight); bf16 for the MXU
        self.wq = (jax.random.normal(k1, (d_model, d_model)) * s).astype(jnp.bfloat16)
        self.bq = (jax.random.normal(k2, (1, d_model)) * s).astype(jnp.float32)
        wkv = jax.random.normal(k3, (d_model, 2 * d_model)) * s
        bkv = jax.random.normal(k4, (1, 2 * d_model)) * s
        # split the kv projection so K and V never round-trip HBM as a fused [T, 2C] slab
        self.wk = wkv[:, :d_model].astype(jnp.bfloat16)
        self.wv = wkv[:, d_model:].astype(jnp.bfloat16)
        self.bk = bkv[:, :d_model].astype(jnp.float32)
        self.bv = bkv[:, d_model:].astype(jnp.float32)
        self.wproj = (jax.random.normal(k5, (d_model, d_model)) * s).astype(jnp.bfloat16)
        self.bproj = (jax.random.normal(k6, (1, d_model)) * s).astype(jnp.float32)

    def _kv_gather_indices(self, mask, Mpad, total):
        # host-side (mask lengths are static Python ints, as in the PyTorch varlen path)
        starts = np.concatenate([[0], np.cumsum(mask)]).astype(np.int32)
        B = len(mask)
        idx = starts[:B, None] + np.arange(Mpad, dtype=np.int32)[None, :]
        idx = np.minimum(idx, total - 1)          # clipped rows are masked by klen anyway
        return jnp.asarray(idx, dtype=jnp.int32)

    def __call__(self, x, cond, mask):
        """x: [B, N, C]; cond: [1, sum(mask), C]; mask: python list of kv lengths."""
        B, N, C = x.shape
        H, Dh = self.num_heads, self.head_dim

        # q projection (bf16 activations) -> [B, H, N, Dh]
        xb = x.reshape(B * N, C).astype(jnp.bfloat16)
        q = pallas_linear(xb, self.wq, self.bq, out_dtype=jnp.bfloat16)
        q = q.reshape(B, N, H, Dh).transpose(0, 2, 1, 3)

        # separate K / V projections on the packed cond tokens
        total = cond.shape[1]
        cb = cond.reshape(total, C).astype(jnp.bfloat16)
        k_packed = pallas_linear(cb, self.wk, self.bk, out_dtype=jnp.bfloat16)   # [total, C]
        v_packed = pallas_linear(cb, self.wv, self.bv, out_dtype=jnp.bfloat16)

        # unpack varlen kv into a 128-aligned padded [B, H, Mpad, Dh] buffer
        # TODO(synk): gather the packed varlen K/V inside the attention kernel via
        # scalar-prefetched seq starts + manual make_async_copy to skip this padded copy.
        Mpad = _round_up(max(mask), 128)
        idx = self._kv_gather_indices(mask, Mpad, total)                          # [B, Mpad]
        k_pad = jnp.take(k_packed, idx, axis=0).reshape(B, Mpad, H, Dh).transpose(0, 2, 1, 3)
        v_pad = jnp.take(v_packed, idx, axis=0).reshape(B, Mpad, H, Dh).transpose(0, 2, 1, 3)

        # flash-style attention (Pallas kernel)
        klen = jnp.asarray(mask, dtype=jnp.int32)
        out = pallas_cross_attention(q, k_pad, v_pad, klen)                       # [B, H, N, Dh]
        out = out.transpose(0, 2, 1, 3).reshape(B * N, C)

        # output projection (f32 result)
        out = pallas_linear(out, self.wproj, self.bproj, out_dtype=jnp.float32)
        return out.reshape(B, N, C)

    # pure-JAX f32 reference mirroring the PyTorch torch_impl semantics
    def reference(self, x, cond, mask):
        B, N, C = x.shape
        H, Dh = self.num_heads, self.head_dim
        f32 = jnp.float32
        wq, wk, wv, wp = (w.astype(f32) for w in (self.wq, self.wk, self.wv, self.wproj))
        q = (x.reshape(B * N, C) @ wq + self.bq).reshape(B, N, H, Dh)
        total = cond.shape[1]
        c2 = cond.reshape(total, C)
        k_packed = c2 @ wk + self.bk
        v_packed = c2 @ wv + self.bv
        Mpad = _round_up(max(mask), 128)
        idx = self._kv_gather_indices(mask, Mpad, total)
        k_pad = jnp.take(k_packed, idx, axis=0).reshape(B, Mpad, H, Dh)
        v_pad = jnp.take(v_packed, idx, axis=0).reshape(B, Mpad, H, Dh)
        scale = 1.0 / math.sqrt(Dh)
        s = jnp.einsum('bnhd,bmhd->bhnm', q, k_pad).astype(f32) * scale
        col = jnp.arange(Mpad)[None, None, None, :]
        klen = jnp.asarray(mask)[:, None, None, None]
        s = jnp.where(col >= klen, f32(-1e8), s)
        p = jax.nn.softmax(s, axis=-1)
        o = jnp.einsum('bhnm,bmhd->bnhd', p, v_pad).reshape(B * N, C)
        o = o @ wp + self.bproj
        return o.reshape(B, N, C)


# ----------------------------------------------------------------------------
if __name__ == "__main__":
    B, N, C, H = 2, 16, 32, 4
    mask = [8, 6]                    # valid kv length per batch element
    total_kv = sum(mask)

    key = jax.random.PRNGKey(0)
    kx, kc, kp = jax.random.split(key, 3)
    x = jax.random.normal(kx, (B, N, C), dtype=jnp.float32)
    cond = jax.random.normal(kc, (1, total_kv, C), dtype=jnp.float32)

    module = MultiHeadCrossAttentionPallas(C, H, kp)

    out = jax.block_until_ready(module(x, cond, mask))
    ref = module.reference(x, cond, mask)

    # tolerance accounts for bf16 operands (f32 accumulation) and the approx reciprocal
    np.testing.assert_allclose(np.asarray(out), np.asarray(ref), rtol=5e-2, atol=5e-3)

    print("KERNEL_OK")
</pallas_src>

<mosaic_0001>
module attributes {stable_mosaic.version = 11 : i64} {
  func.func @_linear_kernel(%arg0: i32, %arg1: i32, %arg2: i32, %arg3: memref<32x32xbf16, #tpu.memory_space<vmem>>, %arg4: memref<32x32xbf16, #tpu.memory_space<vmem>>, %arg5: memref<1x32xf32, #tpu.memory_space<vmem>>, %arg6: memref<32x32xbf16, #tpu.memory_space<vmem>>, %arg7: memref<32x32xf32, #tpu.memory_space<vmem>>) attributes {dimension_semantics = [#tpu.dimension_semantics<parallel>, #tpu.dimension_semantics<parallel>, #tpu.dimension_semantics<arbitrary>], iteration_bounds = array<i64: 1, 1, 1>, scalar_prefetch = 0 : i64, scratch_operands = 1 : i64, tpu.core_type = #tpu.core_type<tc>, window_params = [{transform_indices = @transform_0, window_bounds = array<i64: 32, 32>}, {transform_indices = @transform_1, window_bounds = array<i64: 32, 32>}, {transform_indices = @transform_2, window_bounds = array<i64: 1, 32>}, {transform_indices = @transform_3, window_bounds = array<i64: 32, 32>}]} {
    %c0_i32 = arith.constant 0 : i32
    %0 = arith.cmpi eq, %arg2, %c0_i32 : i32
    %1 = arith.extui %0 : i1 to i32
    %c0_i32_0 = arith.constant 0 : i32
    %2 = arith.cmpi ne, %1, %c0_i32_0 : i32
    scf.if %2 {
      %cst_10 = arith.constant 0.000000e+00 : f32
      %12 = vector.broadcast %cst_10 : f32 to vector<32x32xf32>
      %c0_11 = arith.constant 0 : index
      %c0_12 = arith.constant 0 : index
      %13 = vector.load %arg7[%c0_11, %c0_12] : memref<32x32xf32, #tpu.memory_space<vmem>>, vector<32x32xf32>
      tpu.vector_store %arg7[%c0_11, %c0_12], %12 {strides = array<i32>} : memref<32x32xf32, #tpu.memory_space<vmem>>, vector<32x32xf32>,
    } else {
    }
    %c0 = arith.constant 0 : index
    %c0_1 = arith.constant 0 : index
    %3 = vector.load %arg7[%c0, %c0_1] : memref<32x32xf32, #tpu.memory_space<vmem>>, vector<32x32xf32>
    %c0_2 = arith.constant 0 : index
    %c0_3 = arith.constant 0 : index
    %4 = vector.load %arg3[%c0_2, %c0_3] : memref<32x32xbf16, #tpu.memory_space<vmem>>, vector<32x32xbf16>
    %c0_4 = arith.constant 0 : index
    %c0_5 = arith.constant 0 : index
    %5 = vector.load %arg4[%c0_4, %c0_5] : memref<32x32xbf16, #tpu.memory_space<vmem>>, vector<32x32xbf16>
    %cst = arith.constant dense<0.000000e+00> : vector<32x32xf32>
    %6 = tpu.matmul %4, %5, %cst {dimension_numbers = #tpu.dot_dimension_numbers<[1], [0], [0], [1], [0, 0, 1, 1], [], []>} : vector<32x32xbf16>, vector<32x32xbf16>, vector<32x32xf32> -> vector<32x32xf32>
    %7 = arith.addf %3, %6 : vector<32x32xf32>
    %c0_6 = arith.constant 0 : index
    %c0_7 = arith.constant 0 : index
    %8 = vector.load %arg7[%c0_6, %c0_7] : memref<32x32xf32, #tpu.memory_space<vmem>>, vector<32x32xf32>
    tpu.vector_store %arg7[%c0_6, %c0_7], %7 {strides = array<i32>} : memref<32x32xf32, #tpu.memory_space<vmem>>, vector<32x32xf32>,
    %c0_i32_8 = arith.constant 0 : i32
    %9 = arith.cmpi eq, %arg2, %c0_i32_8 : i32
    %10 = arith.extui %9 : i1 to i32
    %c0_i32_9 = arith.constant 0 : i32
    %11 = arith.cmpi ne, %10, %c0_i32_9 : i32
    scf.if %11 {
      %c0_10 = arith.constant 0 : index
      %c0_11 = arith.constant 0 : index
      %12 = vector.load %arg7[%c0_10, %c0_11] : memref<32x32xf32, #tpu.memory_space<vmem>>, vector<32x32xf32>
      %c0_12 = arith.constant 0 : index
      %c0_13 = arith.constant 0 : index
      %13 = vector.load %arg5[%c0_12, %c0_13] : memref<1x32xf32, #tpu.memory_space<vmem>>, vector<1x32xf32>
      %14 = vector.broadcast %13 : vector<1x32xf32> to vector<32x32xf32>
      %15 = arith.addf %12, %14 : vector<32x32xf32>
      %16 = arith.truncf %15 : vector<32x32xf32> to vector<32x32xbf16>
      %c0_14 = arith.constant 0 : index
      %c0_15 = arith.constant 0 : index
      %17 = vector.load %arg6[%c0_14, %c0_15] : memref<32x32xbf16, #tpu.memory_space<vmem>>, vector<32x32xbf16>
      tpu.vector_store %arg6[%c0_14, %c0_15], %16 {strides = array<i32>} : memref<32x32xbf16, #tpu.memory_space<vmem>>, vector<32x32xbf16>,
    } else {
    }
    return
  }
  func.func @transform_0(%arg0: i32, %arg1: i32, %arg2: i32) -> (i32, i32) {
    %c0_i32 = arith.constant 0 : i32
    return %arg0, %arg2 : i32, i32
  }
  func.func @transform_1(%arg0: i32, %arg1: i32, %arg2: i32) -> (i32, i32) {
    %c0_i32 = arith.constant 0 : i32
    return %arg2, %arg1 : i32, i32
  }
  func.func @transform_2(%arg0: i32, %arg1: i32, %arg2: i32) -> (i32, i32) {
    %c0_i32 = arith.constant 0 : i32
    %c0_i32_0 = arith.constant 0 : i32
    return %c0_i32, %arg1 : i32, i32
  }
  func.func @transform_3(%arg0: i32, %arg1: i32, %arg2: i32) -> (i32, i32) {
    %c0_i32 = arith.constant 0 : i32
    return %arg0, %arg1 : i32, i32
  }
}

</mosaic_0001>

<bundles_post_ra>
// kernel: tpu_custom_call.1
= control target key start
LH: loop header
LB: loop body
LE: loop exit
PB: predicated region body
PF: predicated region fallthrough
CT: control target
= control target key end

     0   :  { %8 = vsyncpa [#allocation4], 0  ;;  %s401_s0 = inlined_call_operand.hbm [shape: bf16[32,32], index: 0, kind: input, shape index: {}]   ;;  %s402_s1 = inlined_call_operand.hbm [shape: bf16[32,32], index: 1, kind: input, shape index: {}]   ;;  %s403_s2 = inlined_call_operand.vmem [shape: f32[1,32], index: 2, kind: input, shape index: {}]   ;;  %s404_s3 = inlined_call_operand.hbm [shape: bf16[32,32], index: 3, kind: output, shape index: {}]  }
   0x1   :  { %9 = vsyncpa [#allocation7], 0 }
   0x2   :  { %10 = vsyncpa [#allocation5], 0  ;;  %s317_s12 = smov [#allocation3]   ;;  %s245_s16 = scalar_lea.hbm %s401_s0, 256 }
   0x3   :  { %s16_s13 = sshll.u32 %s317_s12, 4  ;;  %p246_p0 = scmp.ne.s32.totalorder %s401_s0, %s245_s16  ;;  %s17_s13 = int_to_ptr.vmem [resolvable:$true] %s16_s13 }
   0x4   :  { %p249_p1 = scmp.lt.u32.totalorder %s245_s16, %s401_s0 }
   0x6   :  { %p251_p2 = pnand %p249_p1, %p246_p0 }
   0x8   :  { %254 = shalt.err (!%p251_p2)
}
   0x9   :  { %s255_s21 = scalar_lea.vmem %s17_s13, 256  ;;  %p260_p4 = scmp.lt.s32.totalorder %s17_s13, %s17_s13 }
   0xa   :  { %p256_p3 = scmp.ne.s32.totalorder %s17_s13, %s255_s21  ;;  %p261_p5 = scmp.lt.s32.totalorder %s255_s21, %s255_s21 }
   0xc   :  { %p262_p6 = por %p261_p5, %p260_p4 }
   0xe   :  { %p263_p7 = pnand %p262_p6, %p256_p3 }
  0x10   :  { %266 = shalt.err (!%p263_p7)
}
  0x11   :  { %s318_s22 = smov 64   ;;  %s319_s23 = smov 4  }
  0x12   :  { %22 = dma.hbm_to_vmem [thread:$0]  %s401_s0, 256, %s17_s13, [#allocation4], %s318_s22, %s318_s22, %s319_s23  }
  0x13   :  { %s320_s26 = smov [#allocation6]   ;;  %s267_s30 = scalar_lea.hbm %s402_s1, 256 }
  0x14   :  { %s28_s27 = sshll.u32 %s320_s26, 4  ;;  %p268_p8 = scmp.ne.s32.totalorder %s402_s1, %s267_s30  ;;  %s29_s27 = int_to_ptr.vmem [resolvable:$true] %s28_s27 }
  0x15   :  { %p271_p9 = scmp.lt.u32.totalorder %s267_s30, %s402_s1 }
  0x17   :  { %p273_p10 = pnand %p271_p9, %p268_p8 }
  0x19   :  { %276 = shalt.err (!%p273_p10)
}
  0x1a   :  { %s277_s8 = scalar_lea.vmem %s29_s27, 256  ;;  %p282_p12 = scmp.lt.s32.totalorder %s29_s27, %s29_s27 }
  0x1b   :  { %p278_p11 = scmp.ne.s32.totalorder %s29_s27, %s277_s8  ;;  %p283_p13 = scmp.lt.s32.totalorder %s277_s8, %s277_s8 }
  0x1d   :  { %p284_p0 = por %p283_p13, %p282_p12 }
  0x1f   :  { %p285_p1 = pnand %p284_p0, %p278_p11 }
  0x21   :  { %288 = shalt.err (!%p285_p1)
}
  0x22   :  { %34 = dma.hbm_to_vmem [thread:$0]  %s402_s1, 256, %s29_s27, [#allocation7], %s318_s22, %s318_s22, %s319_s23  }
  0x23   :  { %311 = dma.done.wait [#allocation4], 256  }
  0x24   :  { %312 = vsyncadd [#allocation4], 4294967040 }
  0x25   :  { %313 = dma.done.wait [#allocation7], 256  }
  0x26   :  { %314 = vsyncadd [#allocation7], 4294967040  ;;  %vm48_vm0 = vcmask 261120   ;;  %v321_v0 = vmov 0.0   ;;  %v241_v1 = vld [vmem:[#allocation6] sm:$0xff]   ;;  %v242_v2 = vld [vmem:[#allocation6 + $0x8] sm:$0xff]  }
  0x27   :  { %51 = vst.msk [vmem:[#allocation2 + $0x10] sm:$0xff] %vm48_vm0, %v321_v0  ;;  %49 = vst.msk [vmem:[#allocation2] sm:$0xff] %vm48_vm0, %v321_v0  ;;  %227 = vmatprep.subr.bf16.mxu0 %v241_v1  ;;  %v243_v3 = vld [vmem:[#allocation3] sm:$0xff]   ;;  %v244_v4 = vld [vmem:[#allocation3 + $0x8] sm:$0xff]   ;;  %vm185_vm1 = vcmask 257024   ;;  %s322_s11 = smov [#allocation8]  }
  0x28   :  { %50 = vst.msk [vmem:[#allocation2 + $0x8] sm:$0xff] %vm48_vm0, %v321_v0  ;;  %52 = vst.msk [vmem:[#allocation2 + $0x18] sm:$0xff] %vm48_vm0, %v321_v0  ;;  %228 = vmatpush3.bf16.msra.mxu0 %v241_v1  ;;  %231 = vmatprep.mubr.msk.bf16.mxu0 %vm48_vm0, %v243_v3  ;;  %v214_v17 = vld [vmem:[%s403_s2] ss:$0 sm:$0xff]  ;;  %s195_s12 = sshll.u32 %s322_s11, 4  ;;  %s196_s12 = int_to_ptr.vmem [resolvable:$true] %s195_s12 }
  0x29   :  { %229 = vmatprep.subr.bf16.mxu0 %v242_v2  ;;  %s289_s2 = scalar_lea.vmem %s196_s12, 256  ;;  %p294_p3 = scmp.lt.s32.totalorder %s196_s12, %s196_s12 }
  0x2a   :  { %p290_p2 = scmp.ne.s32.totalorder %s196_s12, %s289_s2  ;;  %p295_p4 = scmp.lt.s32.totalorder %s289_s2, %s289_s2 }
  0x2c   :  { %230 = vmatpush3.bf16.msra.mxu0 %v242_v2  ;;  %p296_p5 = por %p295_p4, %p294_p3 }
  0x2e   :  { %v55_v5 = vld [vmem:[#allocation2 + $0x10] sm:$0xff]  ;;  %v53_v6 = vld [vmem:[#allocation2] sm:$0xff]  ;;  %p297_p6 = pnand %p296_p5, %p290_p2 }
  0x2f   :  { %232 = vmatmul.mubr.msk.bf16.vlgmr.msra.gmra.mrb[0].mxu0 %vm48_vm0, %v244_v4  ;;  %v56_v8 = vld [vmem:[#allocation2 + $0x18] sm:$0xff]  ;;  %v54_v11 = vld [vmem:[#allocation2 + $0x8] sm:$0xff] }
 0x102   :  { %v233_v7 = vpop.f32.mrb[0].mxu0 }
 0x103   :  { %v145_v9 = vadd.f32 %v233_v7, %v55_v5  ;;  %v128_v10 = vpop.f32.mrb[1].mxu0 }
 0x104   :  { %v143_v12 = vadd.f32 %v128_v10, %v53_v6  ;;  %v234_v13 = vpop.f32.mrb[2].mxu0 }
 0x105   :  { %149 = vst.msk [vmem:[#allocation2 + $0x10] sm:$0xff] %vm48_vm0, %v145_v9  ;;  %v146_v14 = vadd.f32 %v234_v13, %v56_v8  ;;  %v131_v15 = vpop.f32.mrb[3].mxu0 }
 0x106   :  { %147 = vst.msk [vmem:[#allocation2] sm:$0xff] %vm48_vm0, %v143_v12  ;;  %v144_v16 = vadd.f32 %v131_v15, %v54_v11 }
 0x107   :  { %150 = vst.msk [vmem:[#allocation2 + $0x18] sm:$0xff] %vm48_vm0, %v146_v14 }
 0x108   :  { %148 = vst.msk [vmem:[#allocation2 + $0x8] sm:$0xff] %vm48_vm0, %v144_v16 }
 0x10c   :  { %v156_v18 = vld [vmem:[#allocation2 + $0x10] sm:$0xff] }
 0x10d   :  { %v154_v19 = vld [vmem:[#allocation2] sm:$0xff]  ;;  %v167_v20 = vadd.f32 %v214_v17, %v156_v18 }
 0x10e   :  { %v157_v21 = vld [vmem:[#allocation2 + $0x18] sm:$0xff]  ;;  %v165_v22 = vadd.f32 %v214_v17, %v154_v19 }
 0x10f   :  { %v155_v23 = vld [vmem:[#allocation2 + $0x8] sm:$0xff]  ;;  %v168_v24 = vadd.f32 %v214_v17, %v157_v21  ;;  %v221_v25 = vpack.c.bf16 %v167_v20, %v167_v20 }
 0x110   :  { %v166_v26 = vadd.f32 %v214_v17, %v155_v23  ;;  %v219_v27 = vpack.c.bf16 %v165_v22, %v165_v22 }
 0x111   :  { %v222_v28 = vpack.c.bf16 %v168_v24, %v168_v24  ;;  %188 = vst.msk [vmem:[#allocation8 + $0x8] sm:$0xf] %vm185_vm1, %v221_v25 }
 0x112   :  { %v220_v29 = vpack.c.bf16 %v166_v26, %v166_v26  ;;  %186 = vst.msk [vmem:[#allocation8] sm:$0xf] %vm185_vm1, %v219_v27 }
 0x113   :  { %189 = vst.msk [vmem:[#allocation8 + $0xc] sm:$0xf] %vm185_vm1, %v222_v28 }
 0x114   :  { %187 = vst.msk [vmem:[#allocation8 + $0x4] sm:$0xf] %vm185_vm1, %v220_v29 }
 0x115   :  { %300 = shalt.err (!%p297_p6)
}
 0x116   :  { %s301_s15 = scalar_lea.hbm %s404_s3, 256 }
 0x117   :  { %p302_p7 = scmp.ne.s32.totalorder %s404_s3, %s301_s15  ;;  %p305_p8 = scmp.lt.u32.totalorder %s301_s15, %s404_s3 }
 0x119   :  { %p307_p9 = pnand %p305_p8, %p302_p7 }
 0x11b   :  { %310 = shalt.err (!%p307_p9)
}
 0x11c   :  { %201 = dma.vmem_to_hbm [thread:$0]  %s196_s12, 256, %s404_s3, [#allocation5], %s318_s22, %s318_s22, %s319_s23  }
 0x11d   :  { %315 = dma.done.wait [#allocation5], 256  }
 0x11e   :  { %316 = vsyncadd [#allocation5], 4294967040 }
 0x11f   :  { %205 = vsyncpa [#allocation4], 1 }
 0x120   :  { %206 = vsyncpa [#allocation7], 1 }
 0x121   :  { %207 = vsyncpa [#allocation5], 1 }

</bundles_post_ra>
